<compile_context>
chip_gen: v7x
topology: tpu7x:2x2x1
jax: 0.10.0
libtpu: 0.0.40
codegen_flags: <defaults>
</compile_context>

<pallas_src>
import functools

import jax
import jax.numpy as jnp
from jax.experimental import pallas as pl
from jax.experimental.pallas import tpu as pltpu


def _trl_kernel(spacing_ref, packed_ref, out_ref, *, inv_n):
    """Kernel body.

    spacing_ref : (3,)          f32 SMEM  moving spacing scalars
    packed_ref  : (4, 8, Npad)  f32 VMEM  [f_disp | c_disp | fixed^T | moving^T]
                                          on sublanes 0..2, zero padding elsewhere
    out_ref     : (1, 1)        f32 VMEM  mean registration error
    """
    f_disp = packed_ref[0]                         # (8, Npad)
    c_disp = packed_ref[1]
    fixed = packed_ref[2]
    moving = packed_ref[3]

    # All-landmark vector math (VPU).
    disp = (f_disp + c_disp) * jnp.float32(0.5)
    diff = fixed + disp - moving                   # (8, Npad)

    # Per-coordinate spacing from SMEM scalars, broadcast via a sublane iota +
    # select chain (also forces padding sublanes 3..7 to exactly zero).
    row = jax.lax.broadcasted_iota(jnp.int32, diff.shape, 0)
    scale = jnp.where(row == 0, spacing_ref[0],
            jnp.where(row == 1, spacing_ref[1],
            jnp.where(row == 2, spacing_ref[2], jnp.float32(0.0))))
    d = diff * scale

    # Cross-sublane coordinate sum (XLU), batched sqrt (EUP), single
    # cross-lane reduce; padded lanes contribute exactly 0.
    sumsq = jnp.sum(d * d, axis=0, keepdims=True)  # (1, Npad)
    norms = jnp.sqrt(sumsq)                        # (1, Npad)
    out_ref[...] = jnp.sum(norms, axis=1, keepdims=True) * jnp.float32(inv_n)


def total_registration_loss(fixed_landmarks, moving_landmarks,
                            displacement_field, fixed_spacing, moving_spacing):
    """JAX/Pallas equivalent of TotalRegistrationLoss.forward.

    Assumes B == 1, C == 3 (as the PyTorch reference's broadcasting requires)
    and ignores fixed_spacing (the PyTorch module never uses it).
    """
    del fixed_spacing
    B, C, D, H, W = displacement_field.shape
    assert B == 1 and C == 3, "reference broadcasting only works for B=1, C=3"
    assert fixed_landmarks.shape == moving_landmarks.shape
    N = fixed_landmarks.shape[0]

    fl = fixed_landmarks.astype(jnp.float32)                   # (N, 3)
    ml = moving_landmarks.astype(jnp.float32)                  # (N, 3)

    upper = jnp.array([D - 1, H - 1, W - 1], dtype=jnp.int32)
    fc = jnp.clip(jnp.floor(fl).astype(jnp.int32), 0, upper)   # (N, 3)
    cc = jnp.clip(jnp.ceil(fl).astype(jnp.int32), 0, upper)    # (N, 3)

    # ONE linearized flat gather for floor+ceil; cast AFTER the gather so the
    # full field is never copied / up-cast in HBM.
    lin_f = (fc[:, 0] * H + fc[:, 1]) * W + fc[:, 2]           # (N,)
    lin_c = (cc[:, 0] * H + cc[:, 1]) * W + cc[:, 2]            # (N,)
    lin = jnp.concatenate([lin_f, lin_c])                       # (2N,)
    df_flat = displacement_field[0].reshape(3, D * H * W)       # native dtype
    gathered = jnp.take(df_flat, lin, axis=1).astype(jnp.float32)  # (3, 2N)

    # Pack everything into one lane-dense VMEM block: (4, 8, Npad), zero-padded
    # sublanes/lanes so they contribute nothing to the reduction.
    n_pad = ((N + 127) // 128) * 128
    rows = jnp.concatenate(
        [gathered[:, :N], gathered[:, N:], fl.T, ml.T], axis=0)    # (12, N)
    packed = jnp.pad(rows.reshape(4, 3, N),
                     ((0, 0), (0, 5), (0, n_pad - N)))             # (4, 8, Npad)

    spacing = moving_spacing.astype(jnp.float32).reshape(3)

    # TODO(synk): for very large N on v7x, split Npad over a 2-wide "parallel"
    # grid (one chunk per TensorCore) and combine the two partial sums.
    out = pl.pallas_call(
        functools.partial(_trl_kernel, inv_n=1.0 / N),
        out_shape=jax.ShapeDtypeStruct((1, 1), jnp.float32),
        in_specs=[
            pl.BlockSpec(memory_space=pltpu.MemorySpace.SMEM),   # spacing scalars
            pl.BlockSpec(memory_space=pltpu.MemorySpace.VMEM),   # packed block
        ],
        out_specs=pl.BlockSpec(memory_space=pltpu.MemorySpace.VMEM),
    )(spacing, packed)
    return out[0, 0]


def _reference(fl, ml, df, fs, ms):
    """Pure-JAX re-implementation of the PyTorch forward (for verification)."""
    del fs
    B, C, D, H, W = df.shape
    u = jnp.array([D - 1, H - 1, W - 1], dtype=jnp.int32)
    fc = jnp.clip(jnp.floor(fl).astype(jnp.int32), 0, u)
    cc = jnp.clip(jnp.ceil(fl).astype(jnp.int32), 0, u)
    f_disp = df[0][:, fc[:, 0], fc[:, 1], fc[:, 2]]     # (3, N)
    c_disp = df[0][:, cc[:, 0], cc[:, 1], cc[:, 2]]     # (3, N)
    disp = ((f_disp + c_disp) * 0.5).T                  # (N, 3) == 'b n N -> (b N) n' for B=1
    return jnp.mean(jnp.linalg.norm((fl + disp - ml) * ms.reshape(1, 3), axis=1))


if __name__ == "__main__":
    key = jax.random.PRNGKey(0)
    k1, k2, k3, k4 = jax.random.split(key, 4)

    D, H, W, N = 6, 8, 10, 8
    dims = jnp.array([D, H, W], dtype=jnp.float32)

    # Landmarks partly outside [0, dim-1] to exercise the clamp path.
    fixed_landmarks = jax.random.uniform(k1, (N, 3), minval=-0.5, maxval=1.05) * (dims - 1.0)
    moving_landmarks = jax.random.uniform(k2, (N, 3)) * (dims - 1.0)
    displacement_field = jax.random.normal(k3, (1, 3, D, H, W), dtype=jnp.float32) * 0.5
    fixed_spacing = jnp.array([1.0, 1.25, 1.5], dtype=jnp.float32)   # unused (as in PyTorch)
    moving_spacing = jax.random.uniform(k4, (3,), minval=0.5, maxval=2.0)

    loss = total_registration_loss(fixed_landmarks, moving_landmarks,
                                   displacement_field, fixed_spacing,
                                   moving_spacing)
    loss = jax.block_until_ready(loss)

    ref = _reference(fixed_landmarks, moving_landmarks, displacement_field,
                     fixed_spacing, moving_spacing)
    assert jnp.allclose(loss, ref, rtol=1e-5, atol=1e-5), (loss, ref)

    print("KERNEL_OK")
</pallas_src>

<mosaic_0001>
module attributes {stable_mosaic.version = 11 : i64} {
  func.func @_trl_kernel(%arg0: memref<3xf32, #tpu.memory_space<smem>>, %arg1: memref<4x8x128xf32, #tpu.memory_space<vmem>>, %arg2: memref<1x1xf32, #tpu.memory_space<vmem>>) attributes {dimension_semantics = [], scalar_prefetch = 0 : i64, scratch_operands = 0 : i64, tpu.core_type = #tpu.core_type<tc>} {
    %c0 = arith.constant 0 : index
    %c0_0 = arith.constant 0 : index
    %c0_1 = arith.constant 0 : index
    %0 = vector.load %arg1[%c0, %c0_0, %c0_1] : memref<4x8x128xf32, #tpu.memory_space<vmem>>, vector<1x8x128xf32>
    %1 = vector.shape_cast %0 : vector<1x8x128xf32> to vector<8x128xf32>
    %c1 = arith.constant 1 : index
    %c0_2 = arith.constant 0 : index
    %c0_3 = arith.constant 0 : index
    %2 = vector.load %arg1[%c1, %c0_2, %c0_3] : memref<4x8x128xf32, #tpu.memory_space<vmem>>, vector<1x8x128xf32>
    %3 = vector.shape_cast %2 : vector<1x8x128xf32> to vector<8x128xf32>
    %c2 = arith.constant 2 : index
    %c0_4 = arith.constant 0 : index
    %c0_5 = arith.constant 0 : index
    %4 = vector.load %arg1[%c2, %c0_4, %c0_5] : memref<4x8x128xf32, #tpu.memory_space<vmem>>, vector<1x8x128xf32>
    %5 = vector.shape_cast %4 : vector<1x8x128xf32> to vector<8x128xf32>
    %c3 = arith.constant 3 : index
    %c0_6 = arith.constant 0 : index
    %c0_7 = arith.constant 0 : index
    %6 = vector.load %arg1[%c3, %c0_6, %c0_7] : memref<4x8x128xf32, #tpu.memory_space<vmem>>, vector<1x8x128xf32>
    %7 = vector.shape_cast %6 : vector<1x8x128xf32> to vector<8x128xf32>
    %8 = arith.addf %1, %3 : vector<8x128xf32>
    %cst = arith.constant 5.000000e-01 : f32
    %9 = vector.broadcast %cst : f32 to vector<8x128xf32>
    %10 = arith.mulf %8, %9 : vector<8x128xf32>
    %11 = arith.addf %5, %10 : vector<8x128xf32>
    %12 = arith.subf %11, %7 : vector<8x128xf32>
    %13 = tpu.iota {dimensions = array<i32: 0>} : vector<8x128xi32>
    %c0_i32 = arith.constant 0 : i32
    %14 = vector.broadcast %c0_i32 : i32 to vector<8x128xi32>
    %15 = arith.cmpi eq, %13, %14 : vector<8x128xi32>
    %c0_8 = arith.constant 0 : index
    %16 = memref.load %arg0[%c0_8] : memref<3xf32, #tpu.memory_space<smem>>
    %c1_i32 = arith.constant 1 : i32
    %17 = vector.broadcast %c1_i32 : i32 to vector<8x128xi32>
    %18 = arith.cmpi eq, %13, %17 : vector<8x128xi32>
    %c1_9 = arith.constant 1 : index
    %19 = memref.load %arg0[%c1_9] : memref<3xf32, #tpu.memory_space<smem>>
    %c2_i32 = arith.constant 2 : i32
    %20 = vector.broadcast %c2_i32 : i32 to vector<8x128xi32>
    %21 = arith.cmpi eq, %13, %20 : vector<8x128xi32>
    %c2_10 = arith.constant 2 : index
    %22 = memref.load %arg0[%c2_10] : memref<3xf32, #tpu.memory_space<smem>>
    %cst_11 = arith.constant 0.000000e+00 : f32
    %23 = vector.broadcast %22 : f32 to vector<8x128xf32>
    %24 = vector.broadcast %cst_11 : f32 to vector<8x128xf32>
    %25 = arith.select %21, %23, %24 : vector<8x128xi1>, vector<8x128xf32>
    %26 = vector.broadcast %19 : f32 to vector<8x128xf32>
    %27 = arith.select %18, %26, %25 : vector<8x128xi1>, vector<8x128xf32>
    %28 = vector.broadcast %16 : f32 to vector<8x128xf32>
    %29 = arith.select %15, %28, %27 : vector<8x128xi1>, vector<8x128xf32>
    %30 = arith.mulf %12, %29 : vector<8x128xf32>
    %31 = arith.mulf %30, %30 : vector<8x128xf32>
    %cst_12 = arith.constant dense<0.000000e+00> : vector<128xf32>
    %32 = vector.multi_reduction <add>, %31, %cst_12 [0] : vector<8x128xf32> to vector<128xf32>
    %33 = vector.shape_cast %32 : vector<128xf32> to vector<1x128xf32>
    %34 = math.sqrt %33 : vector<1x128xf32>
    %cst_13 = arith.constant dense<0.000000e+00> : vector<1xf32>
    %35 = vector.multi_reduction <add>, %34, %cst_13 [1] : vector<1x128xf32> to vector<1xf32>
    %36 = vector.shape_cast %35 : vector<1xf32> to vector<1x1xf32>
    %cst_14 = arith.constant 1.250000e-01 : f32
    %37 = vector.broadcast %cst_14 : f32 to vector<1x1xf32>
    %38 = arith.mulf %36, %37 : vector<1x1xf32>
    %c0_15 = arith.constant 0 : index
    %c0_16 = arith.constant 0 : index
    %39 = vector.load %arg2[%c0_15, %c0_16] : memref<1x1xf32, #tpu.memory_space<vmem>>, vector<1x1xf32>
    tpu.vector_store %arg2[%c0_15, %c0_16], %38 {strides = array<i32>} : memref<1x1xf32, #tpu.memory_space<vmem>>, vector<1x1xf32>,
    return
  }
}

</mosaic_0001>

<bundles_post_ra>
// kernel: tpu_custom_call.1
= control target key start
LH: loop header
LB: loop body
LE: loop exit
PB: predicated region body
PF: predicated region fallthrough
CT: control target
= control target key end

     0   :  { %7 = vsyncpa [#allocation5], 0  ;;  %s223_s0 = inlined_call_operand.hbm [shape: f32[3], index: 0, kind: input, shape index: {}]   ;;  %s224_s1 = inlined_call_operand.hbm [shape: f32[4,8,128], index: 1, kind: input, shape index: {}]   ;;  %s225_s2 = inlined_call_operand.hbm [shape: f32[1,1], index: 2, kind: output, shape index: {}]  }
   0x1   :  { %8 = vsyncpa [#allocation3], 0 }
   0x2   :  { %9 = vsyncpa [#allocation4], 0  ;;  %s107_s11 = scalar_lea.hbm %s223_s0, 16 }
   0x3   :  { %p108_p0 = scmp.ne.s32.totalorder %s223_s0, %s107_s11  ;;  %p111_p1 = scmp.lt.u32.totalorder %s107_s11, %s223_s0 }
   0x5   :  { %p113_p2 = pnand %p111_p1, %p108_p0 }
   0x7   :  { %116 = shalt.err (!%p113_p2)
}
   0x8   :  { %s167_s16 = smov [#allocation2]   ;;  %s168_s19 = smov [#allocation6]  }
   0x9   :  { %17 = dma.hbm_to_smem %s223_s0, 16, %s167_s16, [#allocation5]  }
   0xa   :  { %s23_s20 = sshll.u32 %s168_s19, 4  ;;  %s117_s23 = scalar_lea.hbm %s224_s1, 512  ;;  %s24_s20 = int_to_ptr.vmem [resolvable:$true] %s23_s20 }
   0xb   :  { %p118_p3 = scmp.ne.s32.totalorder %s224_s1, %s117_s23  ;;  %p121_p4 = scmp.lt.u32.totalorder %s117_s23, %s224_s1 }
   0xd   :  { %p123_p5 = pnand %p121_p4, %p118_p3 }
   0xf   :  { %126 = shalt.err (!%p123_p5)
}
  0x10   :  { %s127_s28 = scalar_lea.vmem %s24_s20, 512  ;;  %p132_p7 = scmp.lt.s32.totalorder %s24_s20, %s24_s20 }
  0x11   :  { %p128_p6 = scmp.ne.s32.totalorder %s24_s20, %s127_s28  ;;  %p133_p8 = scmp.lt.s32.totalorder %s127_s28, %s127_s28 }
  0x13   :  { %p134_p9 = por %p133_p8, %p132_p7 }
  0x15   :  { %p135_p10 = pnand %p134_p9, %p128_p6 }
  0x17   :  { %138 = shalt.err (!%p135_p10)
}
  0x18   :  { %s169_s0 = smov 128   ;;  %s170_s29 = smov 8  }
  0x19   :  { %29 = dma.hbm_to_vmem [thread:$0]  %s224_s1, 512, %s24_s20, [#allocation3], %s169_s0, %s169_s0, %s170_s29  }
  0x1a   :  { %161 = dma.done.wait [#allocation5], 16  }
  0x1b   :  { %162 = vsyncadd [#allocation5], 4294967280 }
  0x1c   :  { %163 = dma.done.wait [#allocation3], 512  }
  0x1d   :  { %164 = vsyncadd [#allocation3], 4294966784 }
  0x1e   :  { %36 = sfence }
  0x1f   :  { %v37_v0 = vld [vmem:[#allocation6] sm:$0xff]  ;;  %v39_v1 = vld [vmem:[#allocation6 + $0x8] sm:$0xff]  ;;  %v48_v2 = vlaneseq  ;;  %s51_s4 = sld [smem:[#allocation2]]  ;;  %s98_s5 = sld [smem:[#allocation2 + $0x1]]  ;;  %v41_v4 = vld [vmem:[#allocation6 + $0x10] sm:$0xff]  ;;  %vm80_vm5 = vcmask 0  }
  0x20   :  { %v44_v3 = vadd.f32 %v39_v1, %v37_v0  ;;  %s99_s6 = sld [smem:[#allocation2 + $0x2]]  ;;  %v43_v7 = vld [vmem:[#allocation6 + $0x18] sm:$0xff]  ;;  %s171_s1 = smov [#allocation7]  }
  0x21   :  { %v49_v5 = vshrl.u32 %v48_v2, 7  ;;  %s88_s7 = sshll.u32 %s171_s1, 4  ;;  %s89_s7 = int_to_ptr.vmem [resolvable:$true] %s88_s7 }
  0x22   :  { %v45_v6 = vmul.f32 0.5, %v44_v3  ;;  %s139_s8 = scalar_lea.vmem %s89_s7, 16  ;;  %s143_s9 = scalar_lea.vmem %s89_s7, 32 }
  0x23   :  { %vm54_vm0 = vcmp.eq.s32.totalorder %v49_v5, 2  ;;  %vm50_vm1 = vcmp.eq.s32.totalorder %v49_v5, 0  ;;  %vm52_vm2 = vcmp.eq.s32.totalorder %v49_v5, 1  ;;  %p140_p11 = scmp.ne.s32.totalorder %s89_s7, %s139_s8  ;;  %p144_p12 = scmp.lt.s32.totalorder %s89_s7, %s89_s7 }
  0x24   :  { %v46_v8 = vadd.f32 %v45_v6, %v41_v4  ;;  %p145_p13 = scmp.lt.s32.totalorder %s143_s9, %s139_s8 }
  0x25   :  { %v58_v11 = vstv %s98_s5  ;;  %v60_v12 = vstv %s51_s4 }
  0x26   :  { %v47_v9 = vsub.f32 %v46_v8, %v43_v7  ;;  %v56_v10 = vstv %s99_s6  ;;  %p146_p0 = por %p145_p13, %p144_p12 }
  0x27   :  { %v57_v13 = vsel %vm54_vm0, %v56_v10, 0.0 }
  0x28   :  { %v59_v14 = vsel %vm52_vm2, %v58_v11, %v57_v13  ;;  %p147_p1 = pnand %p146_p0, %p140_p11 }
  0x29   :  { %v61_v15 = vsel %vm50_vm1, %v60_v12, %v59_v14 }
  0x2a   :  { %v62_v16 = vmul.f32 %v61_v15, %v47_v9 }
  0x2c   :  { %v63_v17 = vmul.f32 %v62_v16, %v62_v16 }
  0x2e   :  { %v64_v18 = vrot.slane %v63_v17, 4 }
  0x30   :  { %v65_v19 = vadd.f32 %v64_v18, %v63_v17 }
  0x32   :  { %v66_v20 = vrot.slane %v65_v19, 2 }
  0x34   :  { %v67_v21 = vadd.f32 %v66_v20, %v65_v19 }
  0x36   :  { %v68_v22 = vrot.slane %v67_v21, 1 }
  0x38   :  { %v69_v23 = vadd.f32 %v68_v22, %v67_v21 }
  0x3a   :  { %105 = vrsqrt.f32 %v69_v23  ;;  %vm72_vm3 = vcmp.eq.f32.partialorder %v69_v23, inf  ;;  %v75_v25 = vand.u32 2147483648, %v69_v23  ;;  %vm74_vm4 = vcmp.eq.f32.partialorder %v69_v23, 0.0 }
  0x44   :  { %v106_v24 = vpop.eup %105 }
  0x45   :  { %v71_v26 = vmul.f32 %v106_v24, %v69_v23 }
  0x47   :  { %v73_v27 = vsel %vm72_vm3, %v69_v23, %v71_v26 }
  0x48   :  { %v76_v28 = vsel %vm74_vm4, %v75_v25, %v73_v27 }
  0x49   :  { %77 = vadd.xlane.f32.xlu0 %v76_v28 }
  0xd6   :  { %v78_v29 = vpop.xlane.xlu0 %77 }
  0xd7   :  { %v79_v30 = vmul.f32 0.125, %v78_v29 }
  0xd9   :  { %81 = vst.msk [vmem:[#allocation7] sm:$0x1] %vm80_vm5, %v79_v30 }
  0xda   :  { %150 = shalt.err (!%p147_p1)
}
  0xdb   :  { %s151_s12 = scalar_lea.hbm %s225_s2, 16 }
  0xdc   :  { %p152_p2 = scmp.ne.s32.totalorder %s225_s2, %s151_s12  ;;  %p155_p3 = scmp.lt.u32.totalorder %s151_s12, %s225_s2 }
  0xde   :  { %p157_p4 = pnand %p155_p3, %p152_p2 }
  0xe0   :  { %160 = shalt.err (!%p157_p4)
}
  0xe1   :  { %91 = dma.vmem_to_hbm [thread:$0]  %s89_s7, 16, %s225_s2, [#allocation4]  }
  0xe2   :  { %165 = dma.done.wait [#allocation4], 16  }
  0xe3   :  { %166 = vsyncadd [#allocation4], 4294967280 }
  0xe4   :  { %95 = vsyncpa [#allocation3], 1 }
  0xe5   :  { %96 = vsyncpa [#allocation4], 1 }
  0xe6   :  { %97 = vsyncpa [#allocation5], 1 }

</bundles_post_ra>
